<compile_context>
chip_gen: v7x
topology: tpu7x:2x2x1
jax: 0.10.0
libtpu: 0.0.40
codegen_flags: <defaults>
</compile_context>

<pallas_src>
from collections import OrderedDict
from functools import partial
from itertools import chain

import jax
import jax.numpy as jnp
import numpy as np
from jax import lax
from jax.experimental import pallas as pl
from jax.experimental.pallas import tpu as pltpu


# --------------------------- fused Pallas kernel -----------------------------

def _make_fused_kernel(cin, cmid, cout, L, LG, Wp, G, record):
    """conv1(3x3,'same') -> relu1 -> conv2(3x3,'same'), fully fused.

    Layout: every activation is channels-first with the zero-padded spatial
    grid flattened onto lanes:  (C, L),  L = (H+2)*(W+2).
    A 3x3 'same' conv then becomes 9 accumulated matmuls
        acc += W[:, kh, kw, :] @ shift(x, (kh-1)*Wp + (kw-1))
    where the shift is a *static* lane slice of a guard-padded source.
    Values at padded-ring / guard positions are garbage-but-bounded; they are
    masked to zero before feeding conv2 and the wrapper extracts only the
    interior pixels, so they never escape.
    """

    def conv3x3(src_g, w2d, b_col, out_len):
        # src_g: (c_in, out_len + 2G) guarded flat input
        # w2d:   (c_out, 9*c_in), column order (kh, kw, cin)
        c_in = src_g.shape[0]
        acc = None
        for kh in range(3):
            for kw in range(3):
                s = (kh - 1) * Wp + (kw - 1)          # static shift, |s| <= G
                xs = src_g[:, G + s:G + s + out_len]  # static lane slice
                wk = w2d[:, (kh * 3 + kw) * c_in:(kh * 3 + kw + 1) * c_in]
                p = jnp.dot(wk, xs, preferred_element_type=jnp.float32)
                acc = p if acc is None else acc + p
        return acc + b_col                            # bias added once

    def kernel(x_ref, w1_ref, b1_ref, w2_ref, b2_ref, mask_ref, *out_refs):
        if record:
            h1_ref, h2_ref, out_ref = out_refs
        else:
            (out_ref,) = out_refs

        xgg = x_ref[0]                                    # (cin, L + 4G)
        # conv1 computed over the once-guarded range so conv2 can slice it
        # directly (no in-kernel pad/concat needed).
        h1g = conv3x3(xgg, w1_ref[...], b1_ref[...], LG)  # (cmid, L + 2G)
        h2g = jnp.maximum(h1g, 0.0)                       # relu1
        if record:
            h1_ref[0] = h1g[:, G:G + L].astype(h1_ref.dtype)
            h2_ref[0] = h2g[:, G:G + L].astype(h2_ref.dtype)

        # zero the padded ring (= conv2's zero padding) and the guards
        h2m = h2g * mask_ref[...]                         # (cmid, LG)*(1, LG)
        out = conv3x3(h2m, w2_ref[...], b2_ref[...], L)   # (cout, L)
        out_ref[0] = out.astype(out_ref.dtype)

    return kernel


@partial(jax.jit, static_argnames=("record",))
def fused_cnn_forward(x, w1, b1, w2, b2, *, record):
    """NCHW conv1 -> relu -> conv2 (3x3, 'same'). Returns (h1, h2, out) if record."""
    N, Cin, H, W = x.shape
    Cmid = w1.shape[0]
    Cout = w2.shape[0]
    Hp, Wp = H + 2, W + 2          # 'same' zero padding of 1
    L = Hp * Wp                    # flattened padded spatial grid (lane dim)
    G = Wp + 1                     # guard >= max |shift| of a 3x3 window
    LG = L + 2 * G                 # once-guarded length (conv1 output range)
    LGG = L + 4 * G                # twice-guarded length (conv1 input)

    # Layout glue (tiny, fused by XLA around the kernel): zero-pad spatially,
    # flatten HxW onto lanes, add guard zeros.  No transposes anywhere.
    xp = jnp.pad(x, ((0, 0), (0, 0), (1, 1), (1, 1))).reshape(N, Cin, L)
    xgg = jnp.pad(xp, ((0, 0), (0, 0), (2 * G, 2 * G)))          # (N, Cin, LGG)

    # (Cout, Cin, 3, 3) -> (Cout, 9*Cin) with column order (kh, kw, cin)
    w1_2d = jnp.transpose(w1, (0, 2, 3, 1)).reshape(Cmid, 9 * Cin)
    w2_2d = jnp.transpose(w2, (0, 2, 3, 1)).reshape(Cout, 9 * Cmid)
    b1_c = b1.reshape(Cmid, 1)
    b2_c = b2.reshape(Cout, 1)
    # 1.0 on interior pixels, 0.0 on padded ring and guards (once-guarded len)
    mask = jnp.pad(jnp.ones((1, H, W), x.dtype),
                   ((0, 0), (1, 1), (1, 1))).reshape(1, L)
    mask_g = jnp.pad(mask, ((0, 0), (G, G)))                     # (1, LG)

    kernel = _make_fused_kernel(Cin, Cmid, Cout, L, LG, Wp, G, record)

    def flat_spec(C):
        return pl.BlockSpec((1, C, L), lambda n: (n, 0, 0))

    if record:
        out_shape = (jax.ShapeDtypeStruct((N, Cmid, L), x.dtype),
                     jax.ShapeDtypeStruct((N, Cmid, L), x.dtype),
                     jax.ShapeDtypeStruct((N, Cout, L), x.dtype))
        out_specs = (flat_spec(Cmid), flat_spec(Cmid), flat_spec(Cout))
    else:
        out_shape = jax.ShapeDtypeStruct((N, Cout, L), x.dtype)
        out_specs = flat_spec(Cout)

    outs = pl.pallas_call(
        kernel,
        out_shape=out_shape,
        grid=(N,),
        in_specs=[
            pl.BlockSpec((1, Cin, LGG), lambda n: (n, 0, 0)),
            pl.BlockSpec((Cmid, 9 * Cin), lambda n: (0, 0)),
            pl.BlockSpec((Cmid, 1), lambda n: (0, 0)),
            pl.BlockSpec((Cout, 9 * Cmid), lambda n: (0, 0)),
            pl.BlockSpec((Cout, 1), lambda n: (0, 0)),
            pl.BlockSpec((1, LG), lambda n: (0, 0)),
        ],
        out_specs=out_specs,
        compiler_params=pltpu.CompilerParams(
            dimension_semantics=("parallel",)),   # batch across both TCs on v7x
    )(xgg, w1_2d, b1_c, w2_2d, b2_c, mask_g)

    def interior(a, C):
        # (N, C, Hp*Wp) -> PyTorch-facing NCHW; reshape + slice, no transpose.
        return a.reshape(N, C, Hp, Wp)[:, :, 1:1 + H, 1:1 + W]

    if record:
        h1f, h2f, outf = outs
        return interior(h1f, Cmid), interior(h2f, Cmid), interior(outf, Cout)
    return interior(outs, Cout)


# ----------------------- ActivationProbe (JAX port) -------------------------

class ActivationProbe:
    """JAX/Pallas port: records per-layer activations during forward pass."""

    activation_recording_modes = ['both', 'input', 'output']

    def __init__(self, params, verbose=True, activation_recording_mode='both',
                 single_layer_activation_recording=None):
        self.verbose = verbose
        self.params = params
        self.layers = ['conv1', 'relu1', 'conv2']  # wrapped model's leaf layers
        if (single_layer_activation_recording is not None and
                single_layer_activation_recording not in self.layers):
            raise ValueError(
                f'Layer {single_layer_activation_recording} not present in model layers')
        self.single_layer_activation_recording = single_layer_activation_recording
        self.activation_recording_mode = 'both'
        self.change_activation_rec_mode(activation_recording_mode)
        self.output_activations = OrderedDict()
        self.input_activations = OrderedDict()
        self.attentions = OrderedDict()  # wrapped CNN has no attention layers
        self.record_activations = False
        # TODO(synk): torch forward-hook registration has no JAX equivalent;
        # recording is done explicitly per layer in forward().

    # -- recording controls (mirror the torch API) --
    def activation_recording(self, mode):
        self.record_activations = mode
        return self

    def pause_activation_rec(self):
        self.record_activations = False
        return self

    def resume_activation_rec(self):
        self.record_activations = True
        return self

    def change_activation_rec_mode(self, newmode):
        if newmode in ActivationProbe.activation_recording_modes:
            self.activation_recording_mode = newmode
            return self
        raise ValueError('Unknown activation recording mode.')

    def clear_records(self):
        self.input_activations = OrderedDict()
        self.output_activations = OrderedDict()
        self.attentions = OrderedDict()
        return self

    def silence(self):
        self.verbose = False
        return self

    def _hook(self, name, layer_input, layer_output):
        if not self.record_activations:
            return
        if (self.single_layer_activation_recording is not None and
                self.single_layer_activation_recording != name):
            return
        if self.activation_recording_mode in ('output', 'both'):
            self.output_activations[name] = layer_output  # .detach() is a no-op in JAX
        if self.activation_recording_mode in ('input', 'both'):
            self.input_activations[name] = layer_input

    def forward(self, x, return_activations=False):
        p = self.params
        if self.record_activations:
            # Fused kernel emits every layer's activation in one launch so the
            # "hooks" can record them; intermediates never make separate HBM
            # round trips.
            h1, h2, out = fused_cnn_forward(
                x, p['conv1']['w'], p['conv1']['b'],
                p['conv2']['w'], p['conv2']['b'], record=True)
            self._hook('conv1', x, h1)
            self._hook('relu1', h1, h2)
            self._hook('conv2', h2, out)
        else:
            out = fused_cnn_forward(
                x, p['conv1']['w'], p['conv1']['b'],
                p['conv2']['w'], p['conv2']['b'], record=False)

        if self.record_activations and return_activations:
            if self.activation_recording_mode in ('both', 'output'):
                return self.output_activations
            return OrderedDict(chain(self.input_activations.items(),
                                     OrderedDict(out=out).items()))
        return out

    def __call__(self, x, return_activations=False):
        return self.forward(x, return_activations=return_activations)


# ------------------------------- main ----------------------------------------

def _reference_conv(x_nchw, w_oihw, bias):
    x_nhwc = jnp.transpose(x_nchw, (0, 2, 3, 1))
    w_hwio = jnp.transpose(w_oihw, (2, 3, 1, 0))
    y = lax.conv_general_dilated(
        x_nhwc, w_hwio, window_strides=(1, 1), padding='SAME',
        dimension_numbers=('NHWC', 'HWIO', 'NHWC'))
    y = y + bias.reshape(1, 1, 1, -1)
    return jnp.transpose(y, (0, 3, 1, 2))


if __name__ == "__main__":
    key = jax.random.PRNGKey(0)
    kx, kw1, kb1, kw2, kb2 = jax.random.split(key, 5)

    N, Cin, H, W = 2, 4, 16, 16
    Cmid, Cout = 8, 8

    x = jax.random.normal(kx, (N, Cin, H, W), jnp.float32)
    params = {
        'conv1': {'w': 0.1 * jax.random.normal(kw1, (Cmid, Cin, 3, 3), jnp.float32),
                  'b': 0.1 * jax.random.normal(kb1, (Cmid,), jnp.float32)},
        'conv2': {'w': 0.1 * jax.random.normal(kw2, (Cout, Cmid, 3, 3), jnp.float32),
                  'b': 0.1 * jax.random.normal(kb2, (Cout,), jnp.float32)},
    }

    probe = ActivationProbe(params, verbose=False,
                            activation_recording_mode='both')
    probe.activation_recording(True)

    acts = probe(x, return_activations=True)
    acts = jax.tree_util.tree_map(jax.block_until_ready, dict(acts))

    # plain model output path (no activation return) -> single-output kernel
    probe2 = ActivationProbe(params, verbose=False).activation_recording(False)
    out = jax.block_until_ready(probe2(x))

    # correctness check against plain-JAX reference
    ref1 = _reference_conv(x, params['conv1']['w'], params['conv1']['b'])
    ref_relu = jnp.maximum(ref1, 0.0)
    ref2 = _reference_conv(ref_relu, params['conv2']['w'], params['conv2']['b'])
    np.testing.assert_allclose(np.asarray(acts['conv1']), np.asarray(ref1),
                               rtol=1e-4, atol=1e-4)
    np.testing.assert_allclose(np.asarray(acts['relu1']), np.asarray(ref_relu),
                               rtol=1e-4, atol=1e-4)
    np.testing.assert_allclose(np.asarray(acts['conv2']), np.asarray(ref2),
                               rtol=1e-4, atol=1e-4)
    np.testing.assert_allclose(np.asarray(out), np.asarray(ref2),
                               rtol=1e-4, atol=1e-4)

    print("KERNEL_OK")
</pallas_src>

<mosaic_0001>
module attributes {stable_mosaic.version = 11 : i64} {
  func.func @kernel(%arg0: i32, %arg1: memref<1x4x400xf32, #tpu.memory_space<vmem>>, %arg2: memref<8x36xf32, #tpu.memory_space<vmem>>, %arg3: memref<8x1xf32, #tpu.memory_space<vmem>>, %arg4: memref<8x72xf32, #tpu.memory_space<vmem>>, %arg5: memref<8x1xf32, #tpu.memory_space<vmem>>, %arg6: memref<1x362xf32, #tpu.memory_space<vmem>>, %arg7: memref<1x8x324xf32, #tpu.memory_space<vmem>>, %arg8: memref<1x8x324xf32, #tpu.memory_space<vmem>>, %arg9: memref<1x8x324xf32, #tpu.memory_space<vmem>>) attributes {dimension_semantics = [#tpu.dimension_semantics<parallel>], iteration_bounds = array<i64: 2>, scalar_prefetch = 0 : i64, scratch_operands = 0 : i64, tpu.core_type = #tpu.core_type<tc>, window_params = [{transform_indices = @transform_0, window_bounds = array<i64: 1, 4, 400>}, {pipeline_mode = #tpu.pipeline_mode<synchronous>, transform_indices = @transform_1, window_bounds = array<i64: 8, 36>}, {pipeline_mode = #tpu.pipeline_mode<synchronous>, transform_indices = @transform_2, window_bounds = array<i64: 8, 1>}, {pipeline_mode = #tpu.pipeline_mode<synchronous>, transform_indices = @transform_3, window_bounds = array<i64: 8, 72>}, {pipeline_mode = #tpu.pipeline_mode<synchronous>, transform_indices = @transform_4, window_bounds = array<i64: 8, 1>}, {pipeline_mode = #tpu.pipeline_mode<synchronous>, transform_indices = @transform_5, window_bounds = array<i64: 1, 362>}, {transform_indices = @transform_6, window_bounds = array<i64: 1, 8, 324>}, {transform_indices = @transform_7, window_bounds = array<i64: 1, 8, 324>}, {transform_indices = @transform_8, window_bounds = array<i64: 1, 8, 324>}]} {
    %c0 = arith.constant 0 : index
    %c0_0 = arith.constant 0 : index
    %c0_1 = arith.constant 0 : index
    %0 = vector.load %arg1[%c0, %c0_0, %c0_1] : memref<1x4x400xf32, #tpu.memory_space<vmem>>, vector<1x4x400xf32>
    %1 = vector.shape_cast %0 : vector<1x4x400xf32> to vector<4x400xf32>
    %c0_2 = arith.constant 0 : index
    %c0_3 = arith.constant 0 : index
    %2 = vector.load %arg2[%c0_2, %c0_3] : memref<8x36xf32, #tpu.memory_space<vmem>>, vector<8x36xf32>
    %c0_4 = arith.constant 0 : index
    %c0_5 = arith.constant 0 : index
    %3 = vector.load %arg3[%c0_4, %c0_5] : memref<8x1xf32, #tpu.memory_space<vmem>>, vector<8x1xf32>
    %4 = vector.extract_strided_slice %1 {offsets = [0, 0], sizes = [4, 362], strides = [1, 1]} : vector<4x400xf32> to vector<4x362xf32>
    %5 = vector.extract_strided_slice %2 {offsets = [0, 0], sizes = [8, 4], strides = [1, 1]} : vector<8x36xf32> to vector<8x4xf32>
    %cst = arith.constant dense<0.000000e+00> : vector<8x362xf32>
    %6 = tpu.matmul %5, %4, %cst {dimension_numbers = #tpu.dot_dimension_numbers<[1], [0], [0], [1], [0, 0, 1, 1], [], []>} : vector<8x4xf32>, vector<4x362xf32>, vector<8x362xf32> -> vector<8x362xf32>
    %7 = vector.extract_strided_slice %1 {offsets = [0, 1], sizes = [4, 362], strides = [1, 1]} : vector<4x400xf32> to vector<4x362xf32>
    %8 = vector.extract_strided_slice %2 {offsets = [0, 4], sizes = [8, 4], strides = [1, 1]} : vector<8x36xf32> to vector<8x4xf32>
    %cst_6 = arith.constant dense<0.000000e+00> : vector<8x362xf32>
    %9 = tpu.matmul %8, %7, %cst_6 {dimension_numbers = #tpu.dot_dimension_numbers<[1], [0], [0], [1], [0, 0, 1, 1], [], []>} : vector<8x4xf32>, vector<4x362xf32>, vector<8x362xf32> -> vector<8x362xf32>
    %10 = arith.addf %6, %9 : vector<8x362xf32>
    %11 = vector.extract_strided_slice %1 {offsets = [0, 2], sizes = [4, 362], strides = [1, 1]} : vector<4x400xf32> to vector<4x362xf32>
    %12 = vector.extract_strided_slice %2 {offsets = [0, 8], sizes = [8, 4], strides = [1, 1]} : vector<8x36xf32> to vector<8x4xf32>
    %cst_7 = arith.constant dense<0.000000e+00> : vector<8x362xf32>
    %13 = tpu.matmul %12, %11, %cst_7 {dimension_numbers = #tpu.dot_dimension_numbers<[1], [0], [0], [1], [0, 0, 1, 1], [], []>} : vector<8x4xf32>, vector<4x362xf32>, vector<8x362xf32> -> vector<8x362xf32>
    %14 = arith.addf %10, %13 : vector<8x362xf32>
    %15 = vector.extract_strided_slice %1 {offsets = [0, 18], sizes = [4, 362], strides = [1, 1]} : vector<4x400xf32> to vector<4x362xf32>
    %16 = vector.extract_strided_slice %2 {offsets = [0, 12], sizes = [8, 4], strides = [1, 1]} : vector<8x36xf32> to vector<8x4xf32>
    %cst_8 = arith.constant dense<0.000000e+00> : vector<8x362xf32>
    %17 = tpu.matmul %16, %15, %cst_8 {dimension_numbers = #tpu.dot_dimension_numbers<[1], [0], [0], [1], [0, 0, 1, 1], [], []>} : vector<8x4xf32>, vector<4x362xf32>, vector<8x362xf32> -> vector<8x362xf32>
    %18 = arith.addf %14, %17 : vector<8x362xf32>
    %19 = vector.extract_strided_slice %1 {offsets = [0, 19], sizes = [4, 362], strides = [1, 1]} : vector<4x400xf32> to vector<4x362xf32>
    %20 = vector.extract_strided_slice %2 {offsets = [0, 16], sizes = [8, 4], strides = [1, 1]} : vector<8x36xf32> to vector<8x4xf32>
    %cst_9 = arith.constant dense<0.000000e+00> : vector<8x362xf32>
    %21 = tpu.matmul %20, %19, %cst_9 {dimension_numbers = #tpu.dot_dimension_numbers<[1], [0], [0], [1], [0, 0, 1, 1], [], []>} : vector<8x4xf32>, vector<4x362xf32>, vector<8x362xf32> -> vector<8x362xf32>
    %22 = arith.addf %18, %21 : vector<8x362xf32>
    %23 = vector.extract_strided_slice %1 {offsets = [0, 20], sizes = [4, 362], strides = [1, 1]} : vector<4x400xf32> to vector<4x362xf32>
    %24 = vector.extract_strided_slice %2 {offsets = [0, 20], sizes = [8, 4], strides = [1, 1]} : vector<8x36xf32> to vector<8x4xf32>
    %cst_10 = arith.constant dense<0.000000e+00> : vector<8x362xf32>
    %25 = tpu.matmul %24, %23, %cst_10 {dimension_numbers = #tpu.dot_dimension_numbers<[1], [0], [0], [1], [0, 0, 1, 1], [], []>} : vector<8x4xf32>, vector<4x362xf32>, vector<8x362xf32> -> vector<8x362xf32>
    %26 = arith.addf %22, %25 : vector<8x362xf32>
    %27 = vector.extract_strided_slice %1 {offsets = [0, 36], sizes = [4, 362], strides = [1, 1]} : vector<4x400xf32> to vector<4x362xf32>
    %28 = vector.extract_strided_slice %2 {offsets = [0, 24], sizes = [8, 4], strides = [1, 1]} : vector<8x36xf32> to vector<8x4xf32>
    %cst_11 = arith.constant dense<0.000000e+00> : vector<8x362xf32>
    %29 = tpu.matmul %28, %27, %cst_11 {dimension_numbers = #tpu.dot_dimension_numbers<[1], [0], [0], [1], [0, 0, 1, 1], [], []>} : vector<8x4xf32>, vector<4x362xf32>, vector<8x362xf32> -> vector<8x362xf32>
    %30 = arith.addf %26, %29 : vector<8x362xf32>
    %31 = vector.extract_strided_slice %1 {offsets = [0, 37], sizes = [4, 362], strides = [1, 1]} : vector<4x400xf32> to vector<4x362xf32>
    %32 = vector.extract_strided_slice %2 {offsets = [0, 28], sizes = [8, 4], strides = [1, 1]} : vector<8x36xf32> to vector<8x4xf32>
    %cst_12 = arith.constant dense<0.000000e+00> : vector<8x362xf32>
    %33 = tpu.matmul %32, %31, %cst_12 {dimension_numbers = #tpu.dot_dimension_numbers<[1], [0], [0], [1], [0, 0, 1, 1], [], []>} : vector<8x4xf32>, vector<4x362xf32>, vector<8x362xf32> -> vector<8x362xf32>
    %34 = arith.addf %30, %33 : vector<8x362xf32>
    %35 = vector.extract_strided_slice %1 {offsets = [0, 38], sizes = [4, 362], strides = [1, 1]} : vector<4x400xf32> to vector<4x362xf32>
    %36 = vector.extract_strided_slice %2 {offsets = [0, 32], sizes = [8, 4], strides = [1, 1]} : vector<8x36xf32> to vector<8x4xf32>
    %cst_13 = arith.constant dense<0.000000e+00> : vector<8x362xf32>
    %37 = tpu.matmul %36, %35, %cst_13 {dimension_numbers = #tpu.dot_dimension_numbers<[1], [0], [0], [1], [0, 0, 1, 1], [], []>} : vector<8x4xf32>, vector<4x362xf32>, vector<8x362xf32> -> vector<8x362xf32>
    %38 = arith.addf %34, %37 : vector<8x362xf32>
    %39 = vector.broadcast %3 : vector<8x1xf32> to vector<8x362xf32>
    %40 = arith.addf %38, %39 : vector<8x362xf32>
    %cst_14 = arith.constant 0.000000e+00 : f32
    %41 = vector.broadcast %cst_14 : f32 to vector<8x362xf32>
    %42 = arith.maximumf %40, %41 : vector<8x362xf32>
    %43 = vector.extract_strided_slice %40 {offsets = [0, 19], sizes = [8, 324], strides = [1, 1]} : vector<8x362xf32> to vector<8x324xf32>
    %c0_15 = arith.constant 0 : index
    %c0_16 = arith.constant 0 : index
    %c0_17 = arith.constant 0 : index
    %44 = vector.load %arg7[%c0_15, %c0_16, %c0_17] : memref<1x8x324xf32, #tpu.memory_space<vmem>>, vector<1x8x324xf32>
    %45 = vector.shape_cast %44 : vector<1x8x324xf32> to vector<8x324xf32>
    %46 = vector.shape_cast %43 : vector<8x324xf32> to vector<1x8x324xf32>
    tpu.vector_store %arg7[%c0_15, %c0_16, %c0_17], %46 {strides = array<i32>} : memref<1x8x324xf32, #tpu.memory_space<vmem>>, vector<1x8x324xf32>,
    %47 = vector.extract_strided_slice %42 {offsets = [0, 19], sizes = [8, 324], strides = [1, 1]} : vector<8x362xf32> to vector<8x324xf32>
    %c0_18 = arith.constant 0 : index
    %c0_19 = arith.constant 0 : index
    %c0_20 = arith.constant 0 : index
    %48 = vector.load %arg8[%c0_18, %c0_19, %c0_20] : memref<1x8x324xf32, #tpu.memory_space<vmem>>, vector<1x8x324xf32>
    %49 = vector.shape_cast %48 : vector<1x8x324xf32> to vector<8x324xf32>
    %50 = vector.shape_cast %47 : vector<8x324xf32> to vector<1x8x324xf32>
    tpu.vector_store %arg8[%c0_18, %c0_19, %c0_20], %50 {strides = array<i32>} : memref<1x8x324xf32, #tpu.memory_space<vmem>>, vector<1x8x324xf32>,
    %c0_21 = arith.constant 0 : index
    %c0_22 = arith.constant 0 : index
    %51 = vector.load %arg6[%c0_21, %c0_22] : memref<1x362xf32, #tpu.memory_space<vmem>>, vector<1x362xf32>
    %52 = vector.broadcast %51 : vector<1x362xf32> to vector<8x362xf32>
    %53 = arith.mulf %42, %52 : vector<8x362xf32>
    %c0_23 = arith.constant 0 : index
    %c0_24 = arith.constant 0 : index
    %54 = vector.load %arg4[%c0_23, %c0_24] : memref<8x72xf32, #tpu.memory_space<vmem>>, vector<8x72xf32>
    %c0_25 = arith.constant 0 : index
    %c0_26 = arith.constant 0 : index
    %55 = vector.load %arg5[%c0_25, %c0_26] : memref<8x1xf32, #tpu.memory_space<vmem>>, vector<8x1xf32>
    %56 = vector.extract_strided_slice %53 {offsets = [0, 0], sizes = [8, 324], strides = [1, 1]} : vector<8x362xf32> to vector<8x324xf32>
    %57 = vector.extract_strided_slice %54 {offsets = [0, 0], sizes = [8, 8], strides = [1, 1]} : vector<8x72xf32> to vector<8x8xf32>
    %cst_27 = arith.constant dense<0.000000e+00> : vector<8x324xf32>
    %58 = tpu.matmul %57, %56, %cst_27 {dimension_numbers = #tpu.dot_dimension_numbers<[1], [0], [0], [1], [0, 0, 1, 1], [], []>} : vector<8x8xf32>, vector<8x324xf32>, vector<8x324xf32> -> vector<8x324xf32>
    %59 = vector.extract_strided_slice %53 {offsets = [0, 1], sizes = [8, 324], strides = [1, 1]} : vector<8x362xf32> to vector<8x324xf32>
    %60 = vector.extract_strided_slice %54 {offsets = [0, 8], sizes = [8, 8], strides = [1, 1]} : vector<8x72xf32> to vector<8x8xf32>
    %cst_28 = arith.constant dense<0.000000e+00> : vector<8x324xf32>
    %61 = tpu.matmul %60, %59, %cst_28 {dimension_numbers = #tpu.dot_dimension_numbers<[1], [0], [0], [1], [0, 0, 1, 1], [], []>} : vector<8x8xf32>, vector<8x324xf32>, vector<8x324xf32> -> vector<8x324xf32>
    %62 = arith.addf %58, %61 : vector<8x324xf32>
    %63 = vector.extract_strided_slice %53 {offsets = [0, 2], sizes = [8, 324], strides = [1, 1]} : vector<8x362xf32> to vector<8x324xf32>
    %64 = vector.extract_strided_slice %54 {offsets = [0, 16], sizes = [8, 8], strides = [1, 1]} : vector<8x72xf32> to vector<8x8xf32>
    %cst_29 = arith.constant dense<0.000000e+00> : vector<8x324xf32>
    %65 = tpu.matmul %64, %63, %cst_29 {dimension_numbers = #tpu.dot_dimension_numbers<[1], [0], [0], [1], [0, 0, 1, 1], [], []>} : vector<8x8xf32>, vector<8x324xf32>, vector<8x324xf32> -> vector<8x324xf32>
    %66 = arith.addf %62, %65 : vector<8x324xf32>
    %67 = vector.extract_strided_slice %53 {offsets = [0, 18], sizes = [8, 324], strides = [1, 1]} : vector<8x362xf32> to vector<8x324xf32>
    %68 = vector.extract_strided_slice %54 {offsets = [0, 24], sizes = [8, 8], strides = [1, 1]} : vector<8x72xf32> to vector<8x8xf32>
    %cst_30 = arith.constant dense<0.000000e+00> : vector<8x324xf32>
    %69 = tpu.matmul %68, %67, %cst_30 {dimension_numbers = #tpu.dot_dimension_numbers<[1], [0], [0], [1], [0, 0, 1, 1], [], []>} : vector<8x8xf32>, vector<8x324xf32>, vector<8x324xf32> -> vector<8x324xf32>
    %70 = arith.addf %66, %69 : vector<8x324xf32>
    %71 = vector.extract_strided_slice %53 {offsets = [0, 19], sizes = [8, 324], strides = [1, 1]} : vector<8x362xf32> to vector<8x324xf32>
    %72 = vector.extract_strided_slice %54 {offsets = [0, 32], sizes = [8, 8], strides = [1, 1]} : vector<8x72xf32> to vector<8x8xf32>
    %cst_31 = arith.constant dense<0.000000e+00> : vector<8x324xf32>
    %73 = tpu.matmul %72, %71, %cst_31 {dimension_numbers = #tpu.dot_dimension_numbers<[1], [0], [0], [1], [0, 0, 1, 1], [], []>} : vector<8x8xf32>, vector<8x324xf32>, vector<8x324xf32> -> vector<8x324xf32>
    %74 = arith.addf %70, %73 : vector<8x324xf32>
    %75 = vector.extract_strided_slice %53 {offsets = [0, 20], sizes = [8, 324], strides = [1, 1]} : vector<8x362xf32> to vector<8x324xf32>
    %76 = vector.extract_strided_slice %54 {offsets = [0, 40], sizes = [8, 8], strides = [1, 1]} : vector<8x72xf32> to vector<8x8xf32>
    %cst_32 = arith.constant dense<0.000000e+00> : vector<8x324xf32>
    %77 = tpu.matmul %76, %75, %cst_32 {dimension_numbers = #tpu.dot_dimension_numbers<[1], [0], [0], [1], [0, 0, 1, 1], [], []>} : vector<8x8xf32>, vector<8x324xf32>, vector<8x324xf32> -> vector<8x324xf32>
    %78 = arith.addf %74, %77 : vector<8x324xf32>
    %79 = vector.extract_strided_slice %53 {offsets = [0, 36], sizes = [8, 324], strides = [1, 1]} : vector<8x362xf32> to vector<8x324xf32>
    %80 = vector.extract_strided_slice %54 {offsets = [0, 48], sizes = [8, 8], strides = [1, 1]} : vector<8x72xf32> to vector<8x8xf32>
    %cst_33 = arith.constant dense<0.000000e+00> : vector<8x324xf32>
    %81 = tpu.matmul %80, %79, %cst_33 {dimension_numbers = #tpu.dot_dimension_numbers<[1], [0], [0], [1], [0, 0, 1, 1], [], []>} : vector<8x8xf32>, vector<8x324xf32>, vector<8x324xf32> -> vector<8x324xf32>
    %82 = arith.addf %78, %81 : vector<8x324xf32>
    %83 = vector.extract_strided_slice %53 {offsets = [0, 37], sizes = [8, 324], strides = [1, 1]} : vector<8x362xf32> to vector<8x324xf32>
    %84 = vector.extract_strided_slice %54 {offsets = [0, 56], sizes = [8, 8], strides = [1, 1]} : vector<8x72xf32> to vector<8x8xf32>
    %cst_34 = arith.constant dense<0.000000e+00> : vector<8x324xf32>
    %85 = tpu.matmul %84, %83, %cst_34 {dimension_numbers = #tpu.dot_dimension_numbers<[1], [0], [0], [1], [0, 0, 1, 1], [], []>} : vector<8x8xf32>, vector<8x324xf32>, vector<8x324xf32> -> vector<8x324xf32>
    %86 = arith.addf %82, %85 : vector<8x324xf32>
    %87 = vector.extract_strided_slice %53 {offsets = [0, 38], sizes = [8, 324], strides = [1, 1]} : vector<8x362xf32> to vector<8x324xf32>
    %88 = vector.extract_strided_slice %54 {offsets = [0, 64], sizes = [8, 8], strides = [1, 1]} : vector<8x72xf32> to vector<8x8xf32>
    %cst_35 = arith.constant dense<0.000000e+00> : vector<8x324xf32>
    %89 = tpu.matmul %88, %87, %cst_35 {dimension_numbers = #tpu.dot_dimension_numbers<[1], [0], [0], [1], [0, 0, 1, 1], [], []>} : vector<8x8xf32>, vector<8x324xf32>, vector<8x324xf32> -> vector<8x324xf32>
    %90 = arith.addf %86, %89 : vector<8x324xf32>
    %91 = vector.broadcast %55 : vector<8x1xf32> to vector<8x324xf32>
    %92 = arith.addf %90, %91 : vector<8x324xf32>
    %c0_36 = arith.constant 0 : index
    %c0_37 = arith.constant 0 : index
    %c0_38 = arith.constant 0 : index
    %93 = vector.load %arg9[%c0_36, %c0_37, %c0_38] : memref<1x8x324xf32, #tpu.memory_space<vmem>>, vector<1x8x324xf32>
    %94 = vector.shape_cast %93 : vector<1x8x324xf32> to vector<8x324xf32>
    %95 = vector.shape_cast %92 : vector<8x324xf32> to vector<1x8x324xf32>
    tpu.vector_store %arg9[%c0_36, %c0_37, %c0_38], %95 {strides = array<i32>} : memref<1x8x324xf32, #tpu.memory_space<vmem>>, vector<1x8x324xf32>,
    return
  }
  func.func @transform_0(%arg0: i32) -> (i32, i32, i32) {
    %c0_i32 = arith.constant 0 : i32
    %c0_i32_0 = arith.constant 0 : i32
    %c0_i32_1 = arith.constant 0 : i32
    return %arg0, %c0_i32, %c0_i32_0 : i32, i32, i32
  }
  func.func @transform_1(%arg0: i32) -> (i32, i32) {
    %c0_i32 = arith.constant 0 : i32
    %c0_i32_0 = arith.constant 0 : i32
    %c0_i32_1 = arith.constant 0 : i32
    return %c0_i32, %c0_i32_0 : i32, i32
  }
  func.func @transform_2(%arg0: i32) -> (i32, i32) {
    %c0_i32 = arith.constant 0 : i32
    %c0_i32_0 = arith.constant 0 : i32
    %c0_i32_1 = arith.constant 0 : i32
    return %c0_i32, %c0_i32_0 : i32, i32
  }
  func.func @transform_3(%arg0: i32) -> (i32, i32) {
    %c0_i32 = arith.constant 0 : i32
    %c0_i32_0 = arith.constant 0 : i32
    %c0_i32_1 = arith.constant 0 : i32
    return %c0_i32, %c0_i32_0 : i32, i32
  }
  func.func @transform_4(%arg0: i32) -> (i32, i32) {
    %c0_i32 = arith.constant 0 : i32
    %c0_i32_0 = arith.constant 0 : i32
    %c0_i32_1 = arith.constant 0 : i32
    return %c0_i32, %c0_i32_0 : i32, i32
  }
  func.func @transform_5(%arg0: i32) -> (i32, i32) {
    %c0_i32 = arith.constant 0 : i32
    %c0_i32_0 = arith.constant 0 : i32
    %c0_i32_1 = arith.constant 0 : i32
    return %c0_i32, %c0_i32_0 : i32, i32
  }
  func.func @transform_6(%arg0: i32) -> (i32, i32, i32) {
    %c0_i32 = arith.constant 0 : i32
    %c0_i32_0 = arith.constant 0 : i32
    %c0_i32_1 = arith.constant 0 : i32
    return %arg0, %c0_i32, %c0_i32_0 : i32, i32, i32
  }
  func.func @transform_7(%arg0: i32) -> (i32, i32, i32) {
    %c0_i32 = arith.constant 0 : i32
    %c0_i32_0 = arith.constant 0 : i32
    %c0_i32_1 = arith.constant 0 : i32
    return %arg0, %c0_i32, %c0_i32_0 : i32, i32, i32
  }
  func.func @transform_8(%arg0: i32) -> (i32, i32, i32) {
    %c0_i32 = arith.constant 0 : i32
    %c0_i32_0 = arith.constant 0 : i32
    %c0_i32_1 = arith.constant 0 : i32
    return %arg0, %c0_i32, %c0_i32_0 : i32, i32, i32
  }
}

</mosaic_0001>

<bundles_post_ra>
// kernel: fused_cnn_forward.1
= control target key start
LH: loop header
LB: loop body
LE: loop exit
PB: predicated region body
PF: predicated region fallthrough
CT: control target
= control target key end

     0   :  { %s3762_s27 = smov 0   ;;  %s4124_s0 = inlined_call_operand.vmem [shape: f32[2,4,400], index: 0, kind: input, shape index: {}]   ;;  %s4125_s1 = inlined_call_operand.vmem [shape: f32[8,36], index: 1, kind: input, shape index: {}]   ;;  %s4126_s2 = inlined_call_operand.vmem [shape: f32[8,1], index: 2, kind: input, shape index: {}]   ;;  %s4127_s3 = inlined_call_operand.vmem [shape: f32[8,72], index: 3, kind: input, shape index: {}]   ;;  %s4128_s4 = inlined_call_operand.vmem [shape: f32[8,1], index: 4, kind: input, shape index: {}]   ;;  %s4129_s5 = inlined_call_operand.vmem [shape: f32[1,362], index: 5, kind: input, shape index: {}]   ;;  %s4130_s6 = inlined_call_operand.vmem [shape: f32[2,8,324], index: 6, kind: output, shape index: {0}]   ;;  %s4131_s7 = inlined_call_operand.vmem [shape: f32[2,8,324], index: 7, kind: output, shape index: {1}]   ;;  %s4132_s8 = inlined_call_operand.vmem [shape: f32[2,8,324], index: 8, kind: output, shape index: {2}]  }
   0x1 LB: > { %s3418_s28 = sadd.s32 4294967295, %s3693_s27   ;;  %p3422_p0 = scmp.ge.s32.totalorder %s3693_s27, 1  ;;  %s3693_s27 = sphi %s3762_s27, %s19_s27  }
   0x2   : > { %p267_p1 = scmp.lt.s32.totalorder %s3693_s27, 3 }
   0x4   : > { %p268_p2 = pnand %p3422_p0, %p267_p1 }
   0x5   : > { %p311_p3 = scmp.lt.s32.totalorder (!%p268_p2), %s3418_s28, 1  ;;  %v3695_v0 = vmov (!%p268_p2), 0.0   ;;  %vm3696_vm0 = vmmov (!%p268_p2), 0   ;;  %s3697_s11 = smov (!%p268_p2), 127   ;;  %v3791_v3 = vld [vmem:[%s4125_s1] sm:$0xff] (!%p268_p2)  ;;  %v3711_v6 = vmov (!%p268_p2), 0  }
   0x6   : > { %271 = sbr.rel (%p268_p2) target bundleno = 825 (0x339), region = 44  ;;  %3530 = vmatprep.subr.mxu1 (!%p268_p2), %v3695_v0  ;;  %3532 = vmatprep.mubr.msk.f32.mxu1 (!%p268_p2), %vm3696_vm0, %v3695_v0  ;;  %s3698_s14 = smov (!%p268_p2), 124   ;;  %v334_v7 = vld [vmem:[%s4126_s2] sm:$0xff] (!%p268_p2)  ;;  %vm353_vm1 = vcmask (!%p268_p2), 1043456   ;;  %vm347_vm2 = vcmask (!%p268_p2), 1039360   ;;  %vm350_vm3 = vcmask (!%p268_p2), 31744  }
   0x7   : > { %424 = vmatprep.mubr.f32.mxu0 (!%p268_p2), %v3695_v0  ;;  %s3699_s15 = smov (!%p268_p2), 126   ;;  %s3700_s16 = smov (!%p268_p2), 120   ;;  %3683 = vset.pattern.permute.xlu1 (!%p268_p2), %v3711_v6  ;;  %vm658_vm4 = vcmask (!%p268_p2), 1031168   ;;  %vm821_vm5 = vcmask (!%p268_p2), 900096   ;;  %vm984_vm6 = vcmask (!%p268_p2), 891904   ;;  %vm1147_vm7 = vcmask (!%p268_p2), 883712  }
   0x8   : > { %s3701_s17 = smov (!%p268_p2), 110   ;;  %s3702_s18 = smov (!%p268_p2), 116   ;;  %3684 = vset.pattern.permute.xlu0 (!%p268_p2), %v3711_v6  ;;  %vm1313_vm8 = vcmask (!%p268_p2), 752640   ;;  %vm1479_vm9 = vcmask (!%p268_p2), 744448   ;;  %vm1645_vm10 = vcmask (!%p268_p2), 736256   ;;  %vm1886_vm11 = vcmask (!%p268_p2), 64512  }
   0x9   : > { %s3703_s19 = smov (!%p268_p2), 109   ;;  %s3704_s20 = smov (!%p268_p2), 112   ;;  %vm1828_vm12 = vcmask (!%p268_p2), 556032  }
   0xa   : > { %s3705_s21 = smov (!%p268_p2), 108   ;;  %s3706_s22 = smov (!%p268_p2), 92  }
   0xb   : > { %s3707_s23 = smov (!%p268_p2), 104   ;;  %s3708_s24 = smov (!%p268_p2), 91  }
   0xc   : > { %s3709_s25 = smov (!%p268_p2), 100   ;;  %s3710_s26 = smov (!%p268_p2), 90  }
   0xd   : > { %s4134_s28 = smov (!%p311_p3, %s3418_s28), 1  ;;  %s3712_s9 = smov 96  }
   0xe   : > { %s3493_s29 = sshll.u32 %s4134_s28, 4 }
   0xf   : > { %s315_s10 = scalar_lea.vmem %s4124_s0, %s3493_s29 }
  0x10   : > { %v3780_v1 = vld [vmem:[%s315_s10] sm:$0xff]  ;;  %v3795_v4 = vld [vmem:[%s315_s10 + $0x8] sm:$0xff] }
  0x11   : > { %341 = vrot.lane.b32.xlu1 %v3780_v1, %s3697_s11  ;;  %v3786_v2 = vcombine.high %v3780_v1, %v3780_v1  ;;  %v1304_v5 = vcombine.high %v3795_v4, %v3795_v4 }
  0x13   : > { %343 = vrot.lane.b32.xlu0 %v3786_v2, %s3697_s11 }
  0x15   : > { %336 = vrot.lane.b32.xlu1 %v3791_v3, %s3698_s14 }
  0x17   : > { %345 = vrot.lane.b32.xlu0 %v3795_v4, %s3697_s11 }
  0x19   : > { %656 = vrot.lane.b32.xlu1 %v3795_v4, %s3699_s15 }
  0x1b   : > { %654 = vrot.lane.b32.xlu0 %v3786_v2, %s3699_s15 }
  0x1d   : > { %650 = vrot.lane.b32.xlu1 %v3791_v3, %s3700_s16 }
  0x1f   : > { %652 = vrot.lane.b32.xlu0 %v3780_v1, %s3699_s15 }
  0x21   : > { %819 = vrot.lane.b32.xlu1 %v3795_v4, %s3701_s17 }
  0x23   : > { %817 = vrot.lane.b32.xlu0 %v3786_v2, %s3701_s17 }
  0x25   : > { %813 = vrot.lane.b32.xlu1 %v3791_v3, %s3702_s18 }
  0x27   : > { %815 = vrot.lane.b32.xlu0 %v3780_v1, %s3701_s17 }
  0x29   : > { %982 = vrot.lane.b32.xlu1 %v3795_v4, %s3703_s19 }
  0x2b   : > { %980 = vrot.lane.b32.xlu0 %v3786_v2, %s3703_s19 }
  0x2d   : > { %976 = vrot.lane.b32.xlu1 %v3791_v3, %s3704_s20 }
  0x2f   : > { %978 = vrot.lane.b32.xlu0 %v3780_v1, %s3703_s19 }
  0x31   : > { %1145 = vrot.lane.b32.xlu1 %v3795_v4, %s3705_s21 }
  0x33   : > { %1143 = vrot.lane.b32.xlu0 %v3786_v2, %s3705_s21 }
  0x35   : > { %1139 = vrot.lane.b32.xlu1 %v3791_v3, %s3705_s21 }
  0x37   : > { %1141 = vrot.lane.b32.xlu0 %v3780_v1, %s3705_s21 }
  0x39   : > { %1309 = vrot.lane.b32.xlu1 %v3795_v4, %s3706_s22 }
  0x3b   : > { %1307 = vrot.lane.b32.xlu0 %v3786_v2, %s3706_s22 }
  0x3d   : > { %1302 = vrot.lane.b32.xlu1 %v3791_v3, %s3707_s23 }
  0x3f   : > { %1305 = vrot.lane.b32.xlu0 %v3780_v1, %s3706_s22 }
  0x41   : > { %1473 = vrot.lane.b32.xlu1 %v3786_v2, %s3708_s24 }
  0x43   : > { %1311 = vrot.lane.b32.xlu0 %v1304_v5, %s3706_s22 }
  0x45   : > { %1471 = vrot.lane.b32.xlu1 %v3780_v1, %s3708_s24 }
  0x47   : > { %1475 = vrot.lane.b32.xlu0 %v3795_v4, %s3708_s24 }
  0x49   : > { %1477 = vrot.lane.b32.xlu1 %v1304_v5, %s3708_s24 }
  0x4b   : > { %1469 = vrot.lane.b32.xlu0 %v3791_v3, %s3709_s25 }
  0x4d   : > { %1641 = vrot.lane.b32.xlu1 %v3795_v4, %s3710_s26 }
  0x4f   : > { %1639 = vrot.lane.b32.xlu0 %v3786_v2, %s3710_s26 }
  0x51   : > { %1637 = vrot.lane.b32.xlu1 %v3780_v1, %s3710_s26 }
  0x53   : > { %1643 = vrot.lane.b32.xlu0 %v1304_v5, %s3710_s26 }
  0x55   : > { %1803 = vperm.xlu1 %3683, %v334_v7  }
  0x57   : > { %1635 = vrot.lane.b32.xlu0 %v3791_v3, %s3712_s9 }
  0x83   : > { %v342_v8 = vpop.permute.xlu1 %341 }
  0x85   : > { %v344_v9 = vpop.permute.xlu0 %343 }
  0x86   : > { %v348_v14 = vsel %vm347_vm2, %v342_v8, %v344_v9 }
  0x87   : > { %v337_v10 = vpop.permute.xlu1 %336 }
  0x89   : > { %v346_v11 = vpop.permute.xlu0 %345 }
  0x8a   : > { %3531 = vmatpush3.msk.msra.mxu1 %vm353_vm1, %v346_v11  ;;  %v349_v12 = vsel %vm347_vm2, %v344_v9, %v346_v11 }
  0x8b   : > { %v657_v13 = vpop.permute.xlu1 %656  ;;  %3428 = vmatprep.subr.msk.mxu0 %vm353_vm1, %v349_v12  ;;  %3533 = vmatmul.mubr.msk.f32.vlgmr.msra.gmra.mrb[0].mxu1 %vm350_vm3, %v337_v10 }
  0x8c   : > { %3429 = vmatpush1.msk.msra.mxu0 %vm353_vm1, %v348_v14  ;;  %3535 = vmatprep.subr.mxu1 %v3695_v0 }
  0x8d   : > { %3430 = vmatmul.mubr.msk.f32.vlgmr.msra.gmra.mrb[0].mxu0 %vm350_vm3, %v337_v10  ;;  %3536 = vmatpush3.msk.msra.mxu1 %vm353_vm1, %v3795_v4  ;;  %v655_v15 = vpop.permute.xlu0 %654 }
  0x8e   : > { %v660_v16 = vsel %vm658_vm4, %v655_v15, %v657_v13  ;;  %3433 = vmatprep.subr.msk.mxu0 %vm353_vm1, %v3786_v2  ;;  %3537 = vmatprep.mubr.msk.f32.mxu1 %vm3696_vm0, %v3695_v0 }
  0x8f   : > { %3540 = vmatprep.subr.mxu1 %v3695_v0  ;;  %v651_v17 = vpop.permute.xlu1 %650  ;;  %3434 = vmatpush1.msk.msra.mxu0 %vm353_vm1, %v3780_v1 }
  0x90   : > { %3538 = vmatmul.mubr.msk.f32.vlgmr.msra.gmra.mrb[2].mxu1 %vm350_vm3, %v3791_v3  ;;  %3438 = vmatprep.subr.msk.mxu0 %vm353_vm1, %v660_v16 }
  0x91   : > { %3541 = vmatpush3.msk.msra.mxu1 %vm353_vm1, %v657_v13  ;;  %v653_v18 = vpop.permute.xlu0 %652  ;;  %3542 = vmatprep.mubr.msk.f32.mxu1 %vm3696_vm0, %v3695_v0 }
  0x92   : > { %573 = vmatprep.mubr.f32.mxu0 %v3695_v0  ;;  %3545 = vmatprep.subr.mxu1 %v3695_v0  ;;  %v659_v20 = vsel %vm658_vm4, %v653_v18, %v655_v15 }
  0x93   : > { %v820_v19 = vpop.permute.xlu1 %819 }
  0x94   : > { %3543 = vmatmul.mubr.msk.f32.vlgmr.msra.gmra.mrb[4].mxu1 %vm350_vm3, %v651_v17 }
  0x95   : > { %3435 = vmatmul.mubr.msk.f32.vlgmr.msra.gmra.mrb[0].mxu0 %vm350_vm3, %v3791_v3  ;;  %v818_v21 = vpop.permute.xlu0 %817  ;;  %3546 = vmatpush3.msk.msra.mxu1 %vm353_vm1, %v820_v19 }
  0x96   : > { %3439 = vmatpush1.msk.msra.mxu0 %vm353_vm1, %v659_v20  ;;  %v823_v22 = vsel %vm821_vm5, %v818_v21, %v820_v19  ;;  %3547 = vmatprep.mubr.msk.f32.mxu1 %vm3696_vm0, %v3695_v0 }
  0x97   : > { %v814_v23 = vpop.permute.xlu1 %813  ;;  %3443 = vmatprep.subr.msk.mxu0 %vm353_vm1, %v823_v22  ;;  %733 = vmatprep.mubr.f32.mxu0 %v3695_v0  ;;  %v1849_v22 = vlaneseq }
  0x98   : > { %3548 = vmatmul.mubr.msk.f32.vlgmr.msra.gmra.mrb[6].mxu1 %vm350_vm3, %v814_v23  ;;  %3550 = vmatprep.subr.mxu1 %v3695_v0 }
  0x99   : > { %v816_v24 = vpop.permute.xlu0 %815  ;;  %3552 = vmatprep.mubr.msk.f32.mxu1 %vm3696_vm0, %v3695_v0 }
  0x9a   : > { %v822_v26 = vsel %vm821_vm5, %v816_v24, %v818_v21 }
  0x9b   : > { %v983_v25 = vpop.permute.xlu1 %982 }
  0x9c   : > { %3551 = vmatpush3.msk.msra.mxu1 %vm353_vm1, %v983_v25 }
  0x9d   : > { %3440 = vmatmul.mubr.msk.f32.vlgmr.msra.gmra.mrb[0].mxu0 %vm350_vm3, %v651_v17  ;;  %v981_v27 = vpop.permute.xlu0 %980  ;;  %3555 = vmatprep.subr.mxu1 %v3695_v0 }
  0x9e   : > { %3444 = vmatpush1.msk.msra.mxu0 %vm353_vm1, %v822_v26  ;;  %v986_v28 = vsel %vm984_vm6, %v981_v27, %v983_v25  ;;  %896 = vmatprep.mubr.f32.mxu0 %v3695_v0  ;;  %v1847_v26 = vld [vmem:[%s4129_s5] sm:$0x7] }
  0x9f   : > { %v977_v29 = vpop.permute.xlu1 %976  ;;  %3448 = vmatprep.subr.msk.mxu0 %vm353_vm1, %v986_v28 }
  0xa0   : > { %3553 = vmatmul.mubr.msk.f32.vlgmr.msra.gmra.mrb[8].mxu1 %vm350_vm3, %v977_v29 }
  0xa1   : > { %v979_v30 = vpop.permute.xlu0 %978  ;;  %3557 = vmatprep.mubr.msk.f32.mxu1 %vm3696_vm0, %v3695_v0 }
  0xa2   : > { %v985_v32 = vsel %vm984_vm6, %v979_v30, %v981_v27 }
  0xa3   : > { %v1146_v31 = vpop.permute.xlu1 %1145 }
  0xa4   : > { %3556 = vmatpush3.msk.msra.mxu1 %vm353_vm1, %v1146_v31 }
  0xa5   : > { %3445 = vmatmul.mubr.msk.f32.vlgmr.msra.gmra.mrb[0].mxu0 %vm350_vm3, %v814_v23  ;;  %v1144_v33 = vpop.permute.xlu0 %1143  ;;  %3560 = vmatprep.subr.mxu1 %v3695_v0  ;;  %v1850_v23 = vshrl.u32 %v1849_v22, 7 }
  0xa6   : > { %3449 = vmatpush1.msk.msra.mxu0 %vm353_vm1, %v985_v32  ;;  %v1149_v34 = vsel %vm1147_vm7, %v1144_v33, %v1146_v31  ;;  %1059 = vmatprep.mubr.f32.mxu0 %v3695_v0 }
  0xa7   : > { %v1140_v35 = vpop.permute.xlu1 %1139  ;;  %3453 = vmatprep.subr.msk.mxu0 %vm353_vm1, %v1149_v34  ;;  %v1859_v24 = vsub.s32 2, %v1850_v23  ;;  %v1855_v30 = vsub.s32 1, %v1850_v23  ;;  %v1851_v34 = vsub.s32 0, %v1850_v23 }
  0xa8   : > { %3558 = vmatmul.mubr.msk.f32.vlgmr.msra.gmra.mrb[10].mxu1 %vm350_vm3, %v1140_v35 }
  0xa9   : > { %v1142_v36 = vpop.permute.xlu0 %1141  ;;  %3562 = vmatprep.mubr.msk.f32.mxu1 %vm3696_vm0, %v3695_v0  ;;  %v1860_v31 = vrot.slane %v1847_v26, %v1859_v24 }
  0xaa   : > { %v1148_v38 = vsel %vm1147_vm7, %v1142_v36, %v1144_v33 }
  0xab   : > { %v1310_v37 = vpop.permute.xlu1 %1309 }
  0xad   : > { %3450 = vmatmul.mubr.msk.f32.vlgmr.msra.gmra.mrb[0].mxu0 %vm350_vm3, %v977_v29  ;;  %v1308_v39 = vpop.permute.xlu0 %1307 }
  0xae   : > { %3454 = vmatpush1.msk.msra.mxu0 %vm353_vm1, %v1148_v38  ;;  %v1315_v40 = vsel %vm1313_vm8, %v1308_v39, %v1310_v37  ;;  %1222 = vmatprep.mubr.f32.mxu0 %v3695_v0 }
  0xaf   : > { %v1303_v41 = vpop.permute.xlu1 %1302  ;;  %3458 = vmatprep.subr.msk.mxu0 %vm353_vm1, %v1315_v40 }
  0xb1   : > { %v1306_v42 = vpop.permute.xlu0 %1305 }
  0xb2   : > { %v1314_v44 = vsel %vm1313_vm8, %v1306_v42, %v1308_v39  ;;  %v1856_v39 = vrot.slane %v1847_v26, %v1855_v30 }
  0xb3   : > { %v1474_v43 = vpop.permute.xlu1 %1473 }
  0xb5   : > { %3455 = vmatmul.mubr.msk.f32.vlgmr.msra.gmra.mrb[0].mxu0 %vm350_vm3, %v1140_v35  ;;  %v1312_v45 = vpop.permute.xlu0 %1311 }
  0xb6   : > { %3459 = vmatpush1.msk.msra.mxu0 %vm353_vm1, %v1314_v44  ;;  %v1316_v46 = vsel %vm1313_vm8, %v1310_v37, %v1312_v45  ;;  %1389 = vmatprep.mubr.f32.mxu0 %v3695_v0  ;;  %v3976_v45 = vld [vmem:[%s4127_s3] sm:$0xff] }
  0xb7   : > { %v1472_v47 = vpop.permute.xlu1 %1471  ;;  %3561 = vmatpush3.msk.msra.mxu1 %vm353_vm1, %v1316_v46 }
  0xb8   : > { %3563 = vmatmul.mubr.msk.f32.vlgmr.msra.gmra.mrb[12].mxu1 %vm350_vm3, %v1303_v41  ;;  %3565 = vmatprep.subr.mxu1 %v3695_v0  ;;  %v1480_v50 = vsel %vm1479_vm9, %v1472_v47, %v1474_v43  ;;  %v1868_v47 = vld [vmem:[%s4128_s4] sm:$0xff] }
  0xb9   : > { %v1476_v48 = vpop.permute.xlu0 %1475  ;;  %3567 = vmatprep.mubr.msk.f32.mxu1 %vm3696_vm0, %v3695_v0 }
  0xba   : > { %v1481_v49 = vsel %vm1479_vm9, %v1474_v43, %v1476_v48  ;;  %v1852_v43 = vrot.slane %v1847_v26, %v1851_v34 }
  0xbb   : > { %v1478_v51 = vpop.permute.xlu1 %1477  ;;  %3463 = vmatprep.subr.msk.mxu0 %vm353_vm1, %v1481_v49 }
  0xbc   : > { %v1482_v52 = vsel %vm1479_vm9, %v1476_v48, %v1478_v51 }
  0xbd   : > { %3460 = vmatmul.mubr.msk.f32.vlgmr.msra.gmra.mrb[0].mxu0 %vm350_vm3, %v1303_v41  ;;  %3566 = vmatpush3.msk.msra.mxu1 %vm353_vm1, %v1482_v52  ;;  %v1470_v53 = vpop.permute.xlu0 %1469 }
  0xbe   : > { %3464 = vmatpush1.msk.msra.mxu0 %vm353_vm1, %v1480_v50  ;;  %3568 = vmatmul.mubr.msk.f32.vlgmr.msra.gmra.mrb[14].mxu1 %vm350_vm3, %v1470_v53 }
  0xbf   : > { %v1642_v54 = vpop.permute.xlu1 %1641  ;;  %1555 = vmatprep.mubr.f32.mxu0 %v3695_v0  ;;  %3570 = vmatprep.subr.mxu1 %v3695_v0 }
  0xc0   : > { %3572 = vmatprep.mubr.msk.f32.mxu1 %vm3696_vm0, %v3695_v0 }
  0xc1   : > { %v1640_v55 = vpop.permute.xlu0 %1639 }
  0xc2   : > { %v1647_v56 = vsel %vm1645_vm10, %v1640_v55, %v1642_v54 }
  0xc3   : > { %v1638_v57 = vpop.permute.xlu1 %1637  ;;  %3468 = vmatprep.subr.msk.mxu0 %vm353_vm1, %v1647_v56 }
  0xc4   : > { %v1646_v58 = vsel %vm1645_vm10, %v1638_v57, %v1640_v55 }
  0xc5   : > { %3465 = vmatmul.mubr.msk.f32.vlgmr.msra.gmra.mrb[0].mxu0 %vm350_vm3, %v1470_v53  ;;  %v1644_v59 = vpop.permute.xlu0 %1643 }
  0xc6   : > { %v1648_v60 = vsel %vm1645_vm10, %v1642_v54, %v1644_v59  ;;  %3469 = vmatpush1.msk.msra.mxu0 %vm353_vm1, %v1646_v58  ;;  %1721 = vmatprep.mubr.f32.mxu0 %v3695_v0 }
  0xc7   : > { %3571 = vmatpush3.msk.msra.mxu1 %vm353_vm1, %v1648_v60 }
  0xc8   : > { %3575 = vmatprep.subr.mxu1 %v3695_v0 }
  0xc9   : > { %v1636_v61 = vpop.permute.xlu0 %1635 }
  0xca   : > { %3573 = vmatmul.mubr.msk.f32.vlgmr.msra.gmra.mrb[16].mxu1 %vm350_vm3, %v1636_v61 }
  0xcb   : > { %3577 = vmatprep.mubr.msk.f32.mxu1 %vm3696_vm0, %v3695_v0 }
  0xcd   : > { %3470 = vmatmul.mubr.msk.f32.vlgmr.msra.gmra.mrb[0].mxu0 %vm350_vm3, %v1636_v61 }
  0xce   : > { %1953 = vmatprep.mubr.f32.mxu0 %v3695_v0 }
  0xd4   : > { %v1804_v27 = vpop.permute.xlu1 %1803 }
 0x15e   : > { %v497_v62 = vpop.f32.mrb[0].mxu1 }
 0x15f   : > { %v3534_v63 = vpop.f32.mrb[1].mxu1 }
 0x163   : > { %v646_v1 = vpop.f32.mrb[2].mxu1 }
 0x164   : > { %v647_v2 = vadd.f32 %v646_v1, %v497_v62  ;;  %v3539_v3 = vpop.f32.mrb[3].mxu1 }
 0x167   : > { %v806_v4 = vpop.f32.mrb[4].mxu1 }
 0x168   : > { %v812_v5 = vadd.f32 %v806_v4, %v647_v2  ;;  %v3544_v6 = vpop.f32.mrb[5].mxu1 }
 0x16b   : > { %v969_v7 = vpop.f32.mrb[6].mxu1 }
 0x16c   : > { %v975_v8 = vadd.f32 %v969_v7, %v812_v5  ;;  %v3549_v9 = vpop.f32.mrb[7].mxu1 }
 0x173   : > { %v1132_v10 = vpop.f32.mrb[8].mxu1 }
 0x174   : > { %v1138_v11 = vadd.f32 %v1132_v10, %v975_v8  ;;  %v3554_v12 = vpop.f32.mrb[9].mxu1 }
 0x17b   : > { %v1295_v13 = vpop.f32.mrb[10].mxu1 }
 0x17c   : > { %v1301_v14 = vadd.f32 %v1295_v13, %v1138_v11  ;;  %v3559_v15 = vpop.f32.mrb[11].mxu1 }
 0x18b   : > { %v1462_v16 = vpop.f32.mrb[12].mxu1 }
 0x18c   : > { %v1468_v17 = vadd.f32 %v1462_v16, %v1301_v14  ;;  %v3564_v18 = vpop.f32.mrb[13].mxu1 }
 0x191   : > { %v1628_v19 = vpop.f32.mrb[14].mxu1 }
 0x192   : > { %v1634_v20 = vadd.f32 %v1628_v19, %v1468_v17  ;;  %v3569_v21 = vpop.f32.mrb[15].mxu1 }
 0x19d   : > { %v1794_v25 = vpop.f32.mrb[16].mxu1 }
 0x19e   : > { %v1800_v28 = vadd.f32 %v1794_v25, %v1634_v20  ;;  %v3574_v29 = vpop.f32.mrb[17].mxu1 }
 0x1a0   : > { %v1808_v32 = vadd.f32 %v1804_v27, %v1800_v28  ;;  %v1723_v33 = vpop.f32.mrb[0].mxu0 }
 0x1a1   : > { %v1725_v35 = vpop.f32.mrb[1].mxu0  ;;  %v1806_v37 = vadd.f32 %v1804_v27, %v1723_v33 }
 0x1a2   : > { %v1811_v36 = vmax.f32 %v1808_v32, 0.0  ;;  %v1807_v38 = vadd.f32 %v1804_v27, %v1725_v35 }
 0x1a3   : > { %v1809_v42 = vmax.f32 %v1806_v37, 0.0 }
 0x1a4   : > { %v1866_v40 = vmul.f32 %v1860_v31, %v1811_v36  ;;  %v1810_v41 = vmax.f32 %v1807_v38, 0.0 }
 0x1a5   : > { %v1864_v46 = vmul.f32 %v1852_v43, %v1809_v42 }
 0x1a6   : > { %v3970_v44 = vmul.f32 %v1856_v39, %v1810_v41  ;;  %1879 = vrot.lane.b32.xlu1 %v1866_v40, %s3697_s11 }
 0x1a8   : > { %1877 = vrot.lane.b32.xlu0 %v3970_v44, %s3697_s11 }
 0x1aa   : > { %1870 = vrot.lane.b32.xlu1 %v3976_v45, %s3700_s16  ;;  %s3715_s16 = smov 72  }
 0x1ac   : > { %1875 = vrot.lane.b32.xlu0 %v1864_v46, %s3697_s11  ;;  %s3713_s11 = smov 88  }
 0x1ae   : > { %2179 = vrot.lane.b32.xlu1 %v1866_v40, %s3699_s15 }
 0x1b0   : > { %2177 = vrot.lane.b32.xlu0 %v3970_v44, %s3699_s15 }
 0x1b2   : > { %2173 = vrot.lane.b32.xlu1 %v3976_v45, %s3704_s20 }
 0x1b4   : > { %2175 = vrot.lane.b32.xlu0 %v1864_v46, %s3699_s15  ;;  %s3714_s15 = smov 80  }
 0x1b6   : > { %2338 = vrot.lane.b32.xlu1 %v1866_v40, %s3701_s17 }
 0x1b8   : > { %2336 = vrot.lane.b32.xlu0 %v3970_v44, %s3701_s17 }
 0x1ba   : > { %2332 = vrot.lane.b32.xlu1 %v3976_v45, %s3707_s23 }
 0x1bc   : > { %2334 = vrot.lane.b32.xlu0 %v1864_v46, %s3701_s17  ;;  %s3716_s17 = smov 64  }
 0x1be   : > { %2497 = vrot.lane.b32.xlu1 %v1866_v40, %s3703_s19 }
 0x1c0   : > { %2495 = vrot.lane.b32.xlu0 %v3970_v44, %s3703_s19 }
 0x1c2   : > { %2491 = vrot.lane.b32.xlu1 %v3976_v45, %s3712_s9 }
 0x1c4   : > { %2493 = vrot.lane.b32.xlu0 %v1864_v46, %s3703_s19 }
 0x1c6   : > { %2656 = vrot.lane.b32.xlu1 %v1866_v40, %s3705_s21 }
 0x1c8   : > { %2654 = vrot.lane.b32.xlu0 %v3970_v44, %s3705_s21 }
 0x1ca   : > { %2650 = vrot.lane.b32.xlu1 %v3976_v45, %s3713_s11 }
 0x1cc   : > { %2652 = vrot.lane.b32.xlu0 %v1864_v46, %s3705_s21 }
 0x1ce   : > { %2815 = vrot.lane.b32.xlu1 %v1866_v40, %s3706_s22 }
 0x1d0   : > { %2813 = vrot.lane.b32.xlu0 %v3970_v44, %s3706_s22 }
 0x1d2   : > { %2809 = vrot.lane.b32.xlu1 %v3976_v45, %s3714_s15 }
 0x1d4   : > { %2811 = vrot.lane.b32.xlu0 %v1864_v46, %s3706_s22 }
 0x1d6   : > { %2974 = vrot.lane.b32.xlu1 %v1866_v40, %s3708_s24 }
 0x1d8   : > { %2972 = vrot.lane.b32.xlu0 %v3970_v44, %s3708_s24 }
 0x1da   : > { %2968 = vrot.lane.b32.xlu1 %v3976_v45, %s3715_s16 }
 0x1dc   : > { %2970 = vrot.lane.b32.xlu0 %v1864_v46, %s3708_s24 }
 0x1de   : > { %3133 = vrot.lane.b32.xlu1 %v1866_v40, %s3710_s26 }
 0x1e0   : > { %3131 = vrot.lane.b32.xlu0 %v3970_v44, %s3710_s26 }
 0x1e2   : > { %3127 = vrot.lane.b32.xlu1 %v3976_v45, %s3716_s17 }
 0x1e4   : > { %3129 = vrot.lane.b32.xlu0 %v1864_v46, %s3710_s26 }
 0x1e6   : > { %1815 = vrot.lane.b32.xlu1 %v1806_v37, %s3703_s19 }
 0x1e8   : > { %3288 = vperm.xlu0 %3684, %v1868_v47  }
 0x1ea   : > { %1817 = vrot.lane.b32.xlu1 %v1807_v38, %s3703_s19 }
 0x1ec   : > { %1819 = vrot.lane.b32.xlu0 %v1808_v32, %s3703_s19 }
 0x1ee   : > { %1833 = vrot.lane.b32.xlu1 %v1809_v42, %s3703_s19 }
 0x1f0   : > { %1835 = vrot.lane.b32.xlu0 %v1810_v41, %s3703_s19 }
 0x1f2   : > { %1837 = vrot.lane.b32.xlu1 %v1811_v36, %s3703_s19  ;;  %s4097_s19 = smul.u32 24, %s4134_s28 }
 0x1f4   : > { %s320_s23 = scalar_lea.vmem %s4130_s6, %s4097_s19  ;;  %s325_s25 = scalar_lea.vmem %s4131_s7, %s4097_s19 }
 0x1f5   : > { %s330_s30 = scalar_lea.vmem %s4132_s8, %s4097_s19 }
 0x218   : > { %v1880_v48 = vpop.permute.xlu1 %1879 }
 0x219   : > { %3576 = vmatpush3.msra.mxu1 %v1880_v48 }
 0x21a   : > { %v1878_v49 = vpop.permute.xlu0 %1877  ;;  %3580 = vmatprep.subr.mxu1 %v3695_v0 }
 0x21b   : > { %v1882_v50 = vsel %vm347_vm2, %v1878_v49, %v1880_v48 }
 0x21c   : > { %v1871_v51 = vpop.permute.xlu1 %1870  ;;  %1889 = vmatprep.subr.mxu0 %v1882_v50 }
 0x21d   : > { %3578 = vmatmul.mubr.msk.f32.vlgmr.msra.gmra.mrb[18].mxu1 %vm1886_vm11, %v1871_v51 }
 0x21e   : > { %3581 = vmatpush3.msra.mxu1 %v1866_v40  ;;  %v1876_v52 = vpop.permute.xlu0 %1875  ;;  %3582 = vmatprep.mubr.msk.f32.mxu1 %vm3696_vm0, %v3695_v0 }
 0x21f   : > { %v1881_v53 = vsel %vm347_vm2, %v1876_v52, %v1878_v49  ;;  %3585 = vmatprep.subr.mxu1 %v3695_v0 }
 0x220   : > { %v2180_v54 = vpop.permute.xlu1 %2179  ;;  %1890 = vmatpush1.msra.mxu0 %v1881_v53 }
 0x221   : > { %3473 = vmatmul.mubr.msk.f32.vlgmr.msra.gmra.mrb[2].mxu0 %vm1886_vm11, %v1871_v51  ;;  %2032 = vmatprep.subr.mxu0 %v3970_v44 }
 0x222   : > { %3583 = vmatmul.mubr.msk.f32.vlgmr.msra.gmra.mrb[20].mxu1 %vm1886_vm11, %v3976_v45  ;;  %2033 = vmatpush1.msra.mxu0 %v1864_v46  ;;  %v2178_v55 = vpop.permute.xlu0 %2177 }
 0x223   : > { %3586 = vmatpush3.msra.mxu1 %v2180_v54  ;;  %v2182_v56 = vsel %vm658_vm4, %v2178_v55, %v2180_v54  ;;  %3587 = vmatprep.mubr.msk.f32.mxu1 %vm3696_vm0, %v3695_v0 }
 0x224   : > { %v2174_v57 = vpop.permute.xlu1 %2173  ;;  %2188 = vmatprep.subr.mxu0 %v2182_v56  ;;  %3590 = vmatprep.subr.mxu1 %v3695_v0 }
 0x225   : > { %2096 = vmatprep.mubr.f32.mxu0 %v3695_v0 }
 0x226   : > { %3588 = vmatmul.mubr.msk.f32.vlgmr.msra.gmra.mrb[22].mxu1 %vm1886_vm11, %v2174_v57  ;;  %v2176_v58 = vpop.permute.xlu0 %2175 }
 0x227   : > { %v2181_v59 = vsel %vm658_vm4, %v2176_v58, %v2178_v55  ;;  %3592 = vmatprep.mubr.msk.f32.mxu1 %vm3696_vm0, %v3695_v0 }
 0x228   : > { %v2339_v60 = vpop.permute.xlu1 %2338 }
 0x229   : > { %3475 = vmatmul.mubr.msk.f32.vlgmr.msra.gmra.mrb[2].mxu0 %vm1886_vm11, %v3976_v45  ;;  %3591 = vmatpush3.msra.mxu1 %v2339_v60 }
 0x22a   : > { %2189 = vmatpush1.msra.mxu0 %v2181_v59  ;;  %v2337_v61 = vpop.permute.xlu0 %2336  ;;  %3595 = vmatprep.subr.mxu1 %v3695_v0 }
 0x22b   : > { %v2341_v62 = vsel %vm821_vm5, %v2337_v61, %v2339_v60  ;;  %2252 = vmatprep.mubr.f32.mxu0 %v3695_v0 }
 0x22c   : > { %v2333_v63 = vpop.permute.xlu1 %2332  ;;  %2347 = vmatprep.subr.mxu0 %v2341_v62 }
 0x22d   : > { %3593 = vmatmul.mubr.msk.f32.vlgmr.msra.gmra.mrb[24].mxu1 %vm1886_vm11, %v2333_v63 }
 0x22e   : > { %v2335_v1 = vpop.permute.xlu0 %2334  ;;  %3597 = vmatprep.mubr.msk.f32.mxu1 %vm3696_vm0, %v3695_v0 }
 0x22f   : > { %v2340_v2 = vsel %vm821_vm5, %v2335_v1, %v2337_v61 }
 0x230   : > { %v2498_v3 = vpop.permute.xlu1 %2497 }
 0x231   : > { %3477 = vmatmul.mubr.msk.f32.vlgmr.msra.gmra.mrb[2].mxu0 %vm1886_vm11, %v2174_v57  ;;  %3596 = vmatpush3.msra.mxu1 %v2498_v3 }
 0x232   : > { %2348 = vmatpush1.msra.mxu0 %v2340_v2  ;;  %v2496_v4 = vpop.permute.xlu0 %2495  ;;  %3600 = vmatprep.subr.mxu1 %v3695_v0 }
 0x233   : > { %v2500_v5 = vsel %vm984_vm6, %v2496_v4, %v2498_v3  ;;  %2411 = vmatprep.mubr.f32.mxu0 %v3695_v0 }
 0x234   : > { %v2492_v6 = vpop.permute.xlu1 %2491  ;;  %2506 = vmatprep.subr.mxu0 %v2500_v5 }
 0x235   : > { %3598 = vmatmul.mubr.msk.f32.vlgmr.msra.gmra.mrb[26].mxu1 %vm1886_vm11, %v2492_v6 }
 0x236   : > { %v2494_v7 = vpop.permute.xlu0 %2493  ;;  %3602 = vmatprep.mubr.msk.f32.mxu1 %vm3696_vm0, %v3695_v0 }
 0x237   : > { %v2499_v8 = vsel %vm984_vm6, %v2494_v7, %v2496_v4 }
 0x238   : > { %v2657_v9 = vpop.permute.xlu1 %2656 }
 0x239   : > { %3479 = vmatmul.mubr.msk.f32.vlgmr.msra.gmra.mrb[2].mxu0 %vm1886_vm11, %v2333_v63  ;;  %3601 = vmatpush3.msra.mxu1 %v2657_v9 }
 0x23a   : > { %2507 = vmatpush1.msra.mxu0 %v2499_v8  ;;  %v2655_v10 = vpop.permute.xlu0 %2654  ;;  %3605 = vmatprep.subr.mxu1 %v3695_v0 }
 0x23b   : > { %v2659_v11 = vsel %vm1147_vm7, %v2655_v10, %v2657_v9  ;;  %2570 = vmatprep.mubr.f32.mxu0 %v3695_v0 }
 0x23c   : > { %v2651_v12 = vpop.permute.xlu1 %2650  ;;  %2665 = vmatprep.subr.mxu0 %v2659_v11 }
 0x23d   : > { %3603 = vmatmul.mubr.msk.f32.vlgmr.msra.gmra.mrb[28].mxu1 %vm1886_vm11, %v2651_v12 }
 0x23e   : > { %v2653_v13 = vpop.permute.xlu0 %2652  ;;  %3607 = vmatprep.mubr.msk.f32.mxu1 %vm3696_vm0, %v3695_v0 }
 0x23f   : > { %v2658_v14 = vsel %vm1147_vm7, %v2653_v13, %v2655_v10 }
 0x240   : > { %v2816_v15 = vpop.permute.xlu1 %2815 }
 0x241   : > { %3481 = vmatmul.mubr.msk.f32.vlgmr.msra.gmra.mrb[2].mxu0 %vm1886_vm11, %v2492_v6  ;;  %3606 = vmatpush3.msra.mxu1 %v2816_v15 }
 0x242   : > { %2666 = vmatpush1.msra.mxu0 %v2658_v14  ;;  %v2814_v16 = vpop.permute.xlu0 %2813  ;;  %3610 = vmatprep.subr.mxu1 %v3695_v0 }
 0x243   : > { %v2818_v17 = vsel %vm1313_vm8, %v2814_v16, %v2816_v15  ;;  %2729 = vmatprep.mubr.f32.mxu0 %v3695_v0 }
 0x244   : > { %v2810_v18 = vpop.permute.xlu1 %2809  ;;  %2824 = vmatprep.subr.mxu0 %v2818_v17 }
 0x245   : > { %3608 = vmatmul.mubr.msk.f32.vlgmr.msra.gmra.mrb[30].mxu1 %vm1886_vm11, %v2810_v18 }
 0x246   : > { %v2812_v19 = vpop.permute.xlu0 %2811  ;;  %3612 = vmatprep.mubr.msk.f32.mxu1 %vm3696_vm0, %v3695_v0 }
 0x247   : > { %v2817_v20 = vsel %vm1313_vm8, %v2812_v19, %v2814_v16 }
 0x248   : > { %v2975_v21 = vpop.permute.xlu1 %2974 }
 0x249   : > { %3483 = vmatmul.mubr.msk.f32.vlgmr.msra.gmra.mrb[2].mxu0 %vm1886_vm11, %v2651_v12  ;;  %3611 = vmatpush3.msra.mxu1 %v2975_v21 }
 0x24a   : > { %2825 = vmatpush1.msra.mxu0 %v2817_v20  ;;  %v2973_v22 = vpop.permute.xlu0 %2972  ;;  %3615 = vmatprep.subr.mxu1 %v3695_v0 }
 0x24b   : > { %v2977_v23 = vsel %vm1479_vm9, %v2973_v22, %v2975_v21  ;;  %2888 = vmatprep.mubr.f32.mxu0 %v3695_v0 }
 0x24c   : > { %v2969_v24 = vpop.permute.xlu1 %2968  ;;  %2983 = vmatprep.subr.mxu0 %v2977_v23 }
 0x24d   : > { %3613 = vmatmul.mubr.msk.f32.vlgmr.msra.gmra.mrb[32].mxu1 %vm1886_vm11, %v2969_v24 }
 0x24e   : > { %v2971_v25 = vpop.permute.xlu0 %2970  ;;  %3617 = vmatprep.mubr.msk.f32.mxu1 %vm3696_vm0, %v3695_v0 }
 0x24f   : > { %v2976_v26 = vsel %vm1479_vm9, %v2971_v25, %v2973_v22 }
 0x250   : > { %v3134_v27 = vpop.permute.xlu1 %3133 }
 0x251   : > { %3485 = vmatmul.mubr.msk.f32.vlgmr.msra.gmra.mrb[2].mxu0 %vm1886_vm11, %v2810_v18  ;;  %3616 = vmatpush3.msra.mxu1 %v3134_v27 }
 0x252   : > { %2984 = vmatpush1.msra.mxu0 %v2976_v26  ;;  %v3132_v28 = vpop.permute.xlu0 %3131  ;;  %3047 = vmatprep.mubr.f32.mxu0 %v3695_v0 }
 0x253   : > { %v3136_v29 = vsel %vm1645_vm10, %v3132_v28, %v3134_v27 }
 0x254   : > { %v3128_v30 = vpop.permute.xlu1 %3127  ;;  %3142 = vmatprep.subr.mxu0 %v3136_v29 }
 0x255   : > { %3618 = vmatmul.mubr.msk.f32.vlgmr.msra.gmra.mrb[34].mxu1 %vm1886_vm11, %v3128_v30 }
 0x256   : > { %v3130_v31 = vpop.permute.xlu0 %3129 }
 0x257   : > { %v3135_v32 = vsel %vm1645_vm10, %v3130_v31, %v3132_v28 }
 0x258   : > { %v1816_v33 = vpop.permute.xlu1 %1815 }
 0x259   : > { %3487 = vmatmul.mubr.msk.f32.vlgmr.msra.gmra.mrb[2].mxu0 %vm1886_vm11, %v2969_v24 }
 0x25a   : > { %3143 = vmatpush1.msra.mxu0 %v3135_v32  ;;  %3206 = vmatprep.mubr.f32.mxu0 %v3695_v0 }
 0x25c   : > { %v1818_v34 = vpop.permute.xlu1 %1817 }
 0x25d   : > { %v1821_v35 = vsel %vm984_vm6, %v1816_v33, %v1818_v34 }
 0x25e   : > { %1826 = vst [vmem:[%s320_s23] sm:$0xff] %v1821_v35 }
 0x260   : > { %v1834_v36 = vpop.permute.xlu1 %1833 }
 0x261   : > { %3489 = vmatmul.mubr.msk.f32.vlgmr.msra.gmra.mrb[2].mxu0 %vm1886_vm11, %v3128_v30 }
 0x264   : > { %v1838_v37 = vpop.permute.xlu1 %1837 }
 0x265   : > { %1846 = vst.msk [vmem:[%s325_s25 + $0x10] sm:$0xff] %vm1828_vm12, %v1838_v37 }
 0x267   : > { %v3289_v0 = vpop.permute.xlu0 %3288 }
 0x26b   : > { %v1820_v38 = vpop.permute.xlu0 %1819 }
 0x26c   : > { %v1822_v39 = vsel %vm984_vm6, %v1818_v34, %v1820_v38  ;;  %1829 = vst.msk [vmem:[%s320_s23 + $0x10] sm:$0xff] %vm1828_vm12, %v1820_v38 }
 0x26d   : > { %1827 = vst [vmem:[%s320_s23 + $0x8] sm:$0xff] %v1822_v39 }
 0x26f   : > { %v1836_v40 = vpop.permute.xlu0 %1835 }
 0x270   : > { %v1839_v41 = vsel %vm984_vm6, %v1834_v36, %v1836_v40  ;;  %v1840_v42 = vsel %vm984_vm6, %v1836_v40, %v1838_v37 }
 0x271   : > { %1844 = vst [vmem:[%s325_s25] sm:$0xff] %v1839_v41  ;;  %1845 = vst [vmem:[%s325_s25 + $0x8] sm:$0xff] %v1840_v42 }
 0x2f0   : > { %v2026_v43 = vpop.f32.mrb[18].mxu1 }
 0x2f1   : > { %v3579_v44 = vpop.f32.mrb[19].mxu1 }
 0x2f5   : > { %v2169_v45 = vpop.f32.mrb[20].mxu1 }
 0x2f6   : > { %v2170_v46 = vadd.f32 %v2169_v45, %v2026_v43  ;;  %v3584_v47 = vpop.f32.mrb[21].mxu1 }
 0x2f9   : > { %v2325_v48 = vpop.f32.mrb[22].mxu1 }
 0x2fa   : > { %v2331_v49 = vadd.f32 %v2325_v48, %v2170_v46  ;;  %v3589_v50 = vpop.f32.mrb[23].mxu1 }
 0x300   : > { %v2484_v51 = vpop.f32.mrb[24].mxu1 }
 0x301   : > { %v2490_v52 = vadd.f32 %v2484_v51, %v2331_v49  ;;  %v3594_v53 = vpop.f32.mrb[25].mxu1 }
 0x308   : > { %v2643_v54 = vpop.f32.mrb[26].mxu1 }
 0x309   : > { %v2649_v55 = vadd.f32 %v2643_v54, %v2490_v52  ;;  %v3599_v56 = vpop.f32.mrb[27].mxu1 }
 0x310   : > { %v2802_v57 = vpop.f32.mrb[28].mxu1 }
 0x311   : > { %v2808_v58 = vadd.f32 %v2802_v57, %v2649_v55  ;;  %v3604_v59 = vpop.f32.mrb[29].mxu1 }
 0x318   : > { %v2961_v60 = vpop.f32.mrb[30].mxu1 }
 0x319   : > { %v2967_v61 = vadd.f32 %v2961_v60, %v2808_v58  ;;  %v3609_v62 = vpop.f32.mrb[31].mxu1 }
 0x320   : > { %v3120_v63 = vpop.f32.mrb[32].mxu1 }
 0x321   : > { %v3126_v1 = vadd.f32 %v3120_v63, %v2967_v61  ;;  %v3614_v2 = vpop.f32.mrb[33].mxu1 }
 0x328   : > { %v3279_v3 = vpop.f32.mrb[34].mxu1 }
 0x329   : > { %v3285_v4 = vadd.f32 %v3279_v3, %v3126_v1  ;;  %v3619_v5 = vpop.f32.mrb[35].mxu1 }
 0x32b   : > { %v3293_v6 = vadd.f32 %v3289_v0, %v3285_v4 }
 0x32d   : > { %3296 = vst.msk [vmem:[%s330_s30 + $0x10] sm:$0xff] %vm1828_vm12, %v3293_v6 }
 0x334   : > { %v3208_v7 = vpop.f32.mrb[2].mxu0 }
 0x335   : > { %v3291_v8 = vadd.f32 %v3289_v0, %v3208_v7  ;;  %v3210_v9 = vpop.f32.mrb[3].mxu0 }
 0x336   : > { %v3292_v10 = vadd.f32 %v3289_v0, %v3210_v9 }
 0x337   : > { %3294 = vst [vmem:[%s330_s30] sm:$0xff] %v3291_v8 }
 0x338   : > { %3295 = vst [vmem:[%s330_s30 + $0x8] sm:$0xff] %v3292_v10 }
 0x339 PF: > { %s19_s27 = sadd.s32 1, %s3693_s27  }
 0x33a   : > { %p16_p4 = scmp.ge.s32.totalorder %s19_s27, 4  }
 0x33c   :  { %18 = sbr.rel (!%p16_p4) target bundleno = 1 (0x1), region = 98 }

</bundles_post_ra>
